<compile_context>
chip_gen: v6e
topology: v6e:2x2x1
jax: 0.10.0
libtpu: 0.0.40
codegen_flags: <defaults>
</compile_context>

<pallas_src>
import math

import jax
import jax.numpy as jnp
from jax.experimental import pallas as pl
from jax.experimental.pallas import tpu as pltpu


_EPS = 1e-7


def _cdiv(a: int, b: int) -> int:
    return -(-a // b)


def _vmem_limit_bytes() -> int:
    """Generation-aware scoped-VMEM limit (leaves headroom for compiler scratch)."""
    try:
        cap = int(pltpu.get_tpu_info().vmem_capacity_bytes)
    except Exception:  # interpret mode / unknown target
        cap = 128 * 1024 * 1024
    # ~5/8 of physical: ~40 MiB on v7x (64 MiB/TC), ~80 MiB on v5e/v6e (128 MiB).
    return min(cap * 5 // 8, 96 * 1024 * 1024)


def _pick_c_chunk(c: int, esize: int) -> int:
    """Split channels into two sublane-aligned chunks so pass 1's leading
    "parallel" grid axis can shard across TensorCores (v7x); no-op otherwise."""
    sub = {4: 8, 2: 16, 1: 32}.get(esize, 8)
    if c >= 2 * sub and c % (2 * sub) == 0:
        return c // 2
    return c


def _pick_tile_hw(hw: int, rows_per_block: int, esize: int, budget: int) -> int:
    """Largest lane-dense (multiple-of-128) tile <= hw within the byte budget."""
    if hw <= 128:
        return hw
    bytes_per_lane = max(1, rows_per_block * esize)
    max_lanes = max(128, (budget // bytes_per_lane) // 128 * 128)
    t = min((hw // 128) * 128, max_lanes)
    if hw % 128 == 0:
        # Prefer an exact divisor near t (avoids masked edge tiles) if not too small.
        d = t
        while d >= 128 and hw % d != 0:
            d -= 128
        if d >= 128 and d * 2 >= t:
            return d
    return t


def _pick_tile_n(n: int, per_n_bytes: int, budget: int) -> int:
    """Largest divisor of N such that the whole block stays within the budget."""
    tn = max(1, min(n, budget // max(1, per_n_bytes)))
    while n % tn != 0:
        tn -= 1
    return tn


# --------------------------------------------------------------------------
# Kernels
# --------------------------------------------------------------------------
def _make_stats_kernel(inv_l: float, const: float, tile_hw: int, hw_total: int,
                       eps: float = _EPS):
    needs_mask = (hw_total % tile_hw) != 0

    def kernel(x_ref, gamma_ref, beta_ref, a_ref, b_ref, sum_sc, max_sc, min_sc):
        # grid = (c_chunks [parallel], N tiles [arbitrary], HW tiles [arbitrary])
        n = pl.program_id(1)
        t = pl.program_id(2)
        is_first = jnp.logical_and(n == 0, t == 0)
        is_last = jnp.logical_and(n == pl.num_programs(1) - 1,
                                  t == pl.num_programs(2) - 1)

        @pl.when(is_first)
        def _():
            sum_sc[...] = jnp.zeros_like(sum_sc)
            max_sc[...] = jnp.full_like(max_sc, -jnp.inf)
            min_sc[...] = jnp.full_like(min_sc, jnp.inf)

        x = x_ref[...].astype(jnp.float32)               # (tile_n, c_chunk, tile_hw)
        if needs_mask:
            lane = jax.lax.broadcasted_iota(jnp.int32, x.shape, x.ndim - 1)
            valid = (t * tile_hw + lane) < hw_total
            xs = jnp.where(valid, x, 0.0)
            xmx = jnp.where(valid, x, -jnp.inf)
            xmn = jnp.where(valid, x, jnp.inf)
        else:
            xs = xmx = xmn = x

        # Lane (XLU) reduce first, then the cheap leading-axis (N) reduce.
        sum_sc[...] += jnp.sum(jnp.sum(xs, axis=2, keepdims=True),
                               axis=0, keepdims=True)
        max_sc[...] = jnp.maximum(
            max_sc[...],
            jnp.max(jnp.max(xmx, axis=2, keepdims=True), axis=0, keepdims=True))
        min_sc[...] = jnp.minimum(
            min_sc[...],
            jnp.min(jnp.min(xmn, axis=2, keepdims=True), axis=0, keepdims=True))

        @pl.when(is_last)
        def _():
            mean = sum_sc[...] * inv_l
            # exact: max_l |x - mean| == max(max(x) - mean, mean - min(x))
            abs_max = jnp.maximum(max_sc[...] - mean, mean - min_sc[...])
            scale = 1.0 / (abs_max * const + eps)        # finalize-only divide
            a = scale * gamma_ref[...].astype(jnp.float32)   # per-channel multiplier
            b = beta_ref[...].astype(jnp.float32) - mean * a  # per-channel bias
            a_ref[...] = a
            b_ref[...] = b

    return kernel


def _apply_kernel(a_ref, b_ref, x_ref, o_ref):
    # out = x * a + b  (single FMA per element, purely mem-bound)
    x = x_ref[...].astype(jnp.float32)
    o_ref[...] = (x * a_ref[...] + b_ref[...]).astype(o_ref.dtype)


def _make_fused_kernel(inv_l: float, const: float, eps: float = _EPS):
    def kernel(x_ref, gamma_ref, beta_ref, o_ref):
        x = x_ref[...].astype(jnp.float32)               # (N, C, HW) resident in VMEM
        s = jnp.sum(jnp.sum(x, axis=2, keepdims=True), axis=0, keepdims=True)
        mx = jnp.max(jnp.max(x, axis=2, keepdims=True), axis=0, keepdims=True)
        mn = jnp.min(jnp.min(x, axis=2, keepdims=True), axis=0, keepdims=True)
        mean = s * inv_l
        abs_max = jnp.maximum(mx - mean, mean - mn)
        scale = 1.0 / (abs_max * const + eps)
        a = scale * gamma_ref[...].astype(jnp.float32)
        b = beta_ref[...].astype(jnp.float32) - mean * a
        o_ref[...] = (x * a + b).astype(o_ref.dtype)

    return kernel


# --------------------------------------------------------------------------
# Wrapper
# --------------------------------------------------------------------------
def top1_forward(x_nchw, gamma, beta, *, force_two_pass: bool = False):
    """Top1.forward in training mode (K=1, noise=False).

    x_nchw: (N, C, H, W);  gamma = module.scale (C,);  beta = module.mean (C,)
    """
    N, C, H, W = x_nchw.shape
    HW = H * W
    L = N * HW
    esize = jnp.dtype(x_nchw.dtype).itemsize

    x3 = x_nchw.reshape(N, C, HW)            # free contiguous reshape, no transpose
    gamma3 = gamma.reshape(1, C, 1).astype(jnp.float32)
    beta3 = beta.reshape(1, C, 1).astype(jnp.float32)

    const = 0.5 * (1.0 + math.sqrt(math.pi * math.log(4.0))) / math.sqrt(2.0 * math.log(L))
    inv_l = 1.0 / float(L)

    vmem_limit = _vmem_limit_bytes()

    # ---- Fused single-pass path: whole activation resident in VMEM
    #      (read once + write once == 2x HBM traffic instead of 3x).
    fused_footprint = N * C * HW * (2 * esize + 8)   # in/out blocks + f32 temps
    if (not force_two_pass) and fused_footprint <= vmem_limit // 2:
        out3 = pl.pallas_call(
            _make_fused_kernel(inv_l, const),
            out_shape=jax.ShapeDtypeStruct((N, C, HW), x3.dtype),
            grid=(1,),
            in_specs=[
                pl.BlockSpec((N, C, HW), lambda i: (0, 0, 0)),
                pl.BlockSpec((1, C, 1), lambda i: (0, 0, 0)),
                pl.BlockSpec((1, C, 1), lambda i: (0, 0, 0)),
            ],
            out_specs=pl.BlockSpec((N, C, HW), lambda i: (0, 0, 0)),
            compiler_params=pltpu.CompilerParams(vmem_limit_bytes=vmem_limit),
        )(x3, gamma3, beta3)
        return out3.reshape(N, C, H, W)

    # ---- Pass 1: per-channel sum/max/min -> fused affine coefficients (a, b).
    c_chunk = _pick_c_chunk(C, esize)
    budget1 = vmem_limit // 3                       # 2x in-bufs for x + headroom
    tile_hw1 = _pick_tile_hw(HW, c_chunk, esize, budget1)
    tile_n1 = _pick_tile_n(N, c_chunk * tile_hw1 * esize, budget1)
    n_hw1 = _cdiv(HW, tile_hw1)

    a, b = pl.pallas_call(
        _make_stats_kernel(inv_l, const, tile_hw1, HW),
        out_shape=(
            jax.ShapeDtypeStruct((1, C, 1), jnp.float32),
            jax.ShapeDtypeStruct((1, C, 1), jnp.float32),
        ),
        grid_spec=pltpu.PrefetchScalarGridSpec(
            num_scalar_prefetch=0,
            grid=(C // c_chunk, N // tile_n1, n_hw1),
            in_specs=[
                pl.BlockSpec((tile_n1, c_chunk, tile_hw1), lambda c, n, t: (n, c, t)),
                pl.BlockSpec((1, c_chunk, 1), lambda c, n, t: (0, c, 0)),
                pl.BlockSpec((1, c_chunk, 1), lambda c, n, t: (0, c, 0)),
            ],
            out_specs=(
                pl.BlockSpec((1, c_chunk, 1), lambda c, n, t: (0, c, 0)),
                pl.BlockSpec((1, c_chunk, 1), lambda c, n, t: (0, c, 0)),
            ),
            scratch_shapes=[
                pltpu.VMEM((1, c_chunk, 1), jnp.float32),   # running sum
                pltpu.VMEM((1, c_chunk, 1), jnp.float32),   # running max
                pltpu.VMEM((1, c_chunk, 1), jnp.float32),   # running min
            ],
        ),
        compiler_params=pltpu.CompilerParams(
            dimension_semantics=("parallel", "arbitrary", "arbitrary"),
            vmem_limit_bytes=vmem_limit,
        ),
    )(x3, gamma3, beta3)

    # ---- Pass 2: out = x * a + b, fully parallel lane-dense tiles.
    budget2 = vmem_limit // 6                       # 2x in + 2x out bufs + headroom
    tile_hw2 = _pick_tile_hw(HW, C, esize, budget2)
    tile_n2 = _pick_tile_n(N, C * tile_hw2 * esize, budget2)
    n_hw2 = _cdiv(HW, tile_hw2)

    out3 = pl.pallas_call(
        _apply_kernel,
        out_shape=jax.ShapeDtypeStruct((N, C, HW), x3.dtype),
        grid_spec=pltpu.PrefetchScalarGridSpec(
            num_scalar_prefetch=0,
            grid=(N // tile_n2, n_hw2),
            in_specs=[
                pl.BlockSpec((1, C, 1), lambda n, t: (0, 0, 0)),
                pl.BlockSpec((1, C, 1), lambda n, t: (0, 0, 0)),
                pl.BlockSpec((tile_n2, C, tile_hw2), lambda n, t: (n, 0, t)),
            ],
            out_specs=pl.BlockSpec((tile_n2, C, tile_hw2), lambda n, t: (n, 0, t)),
        ),
        compiler_params=pltpu.CompilerParams(
            dimension_semantics=("parallel", "parallel"),
            vmem_limit_bytes=vmem_limit,
        ),
    )(a, b, x3)

    return out3.reshape(N, C, H, W)


def top1_reference(x, gamma, beta):
    """Plain-JAX reference mirroring the PyTorch code (training, K=1)."""
    N, C, H, W = x.shape
    xf = x.astype(jnp.float32)
    mean = xf.reshape(N, C, -1).mean(-1).mean(0)                  # (C,)
    t = jnp.transpose(xf, (1, 0, 2, 3)).reshape(C, -1)            # (C, L)
    A = jnp.abs(t.T - mean)                                       # (L, C)
    L = A.shape[0]
    const = 0.5 * (1.0 + (math.pi * math.log(4.0)) ** 0.5) / (2.0 * math.log(L)) ** 0.5
    mean_topk = jnp.max(A, axis=0) * const                        # (C,)
    scale = 1.0 / (mean_topk + 1e-7)
    out = (xf - mean.reshape(1, C, 1, 1)) * scale.reshape(1, C, 1, 1)
    out = out * gamma.reshape(1, C, 1, 1) + beta.reshape(1, C, 1, 1)
    return out.astype(x.dtype)


if __name__ == "__main__":
    key = jax.random.PRNGKey(0)
    k_x, k_g, k_b, k_x2 = jax.random.split(key, 4)

    # Case 1: small activation -> fused single-pass path.
    N, C, H, W = 2, 4, 16, 16
    x = jax.random.normal(k_x, (N, C, H, W), dtype=jnp.float32)
    # deterministic parameter init (module.__init__ leaves them uninitialized)
    gamma = 1.0 + 0.1 * jax.random.normal(k_g, (C,), dtype=jnp.float32)  # self.scale
    beta = 0.1 * jax.random.normal(k_b, (C,), dtype=jnp.float32)         # self.mean

    ref = top1_reference(x, gamma, beta)
    out = jax.block_until_ready(top1_forward(x, gamma, beta))
    assert out.shape == (N, C, H, W)
    assert jnp.allclose(out, ref, atol=2e-5, rtol=2e-5), "fused path mismatch"

    # Case 2: same inputs forced through the tiled two-pass path.
    out2 = jax.block_until_ready(top1_forward(x, gamma, beta, force_two_pass=True))
    assert jnp.allclose(out2, ref, atol=2e-5, rtol=2e-5), "two-pass path mismatch"

    # Case 3: ragged spatial size (HW=196, not a multiple of 128) exercising
    #         cdiv grid + masked edge tiles in the stats pass.
    N3, C3, H3, W3 = 2, 8, 14, 14
    x_r = jax.random.normal(k_x2, (N3, C3, H3, W3), dtype=jnp.float32)
    g_r = 1.0 + 0.1 * jax.random.normal(k_g, (C3,), dtype=jnp.float32)
    b_r = 0.1 * jax.random.normal(k_b, (C3,), dtype=jnp.float32)
    ref_r = top1_reference(x_r, g_r, b_r)
    out_r = jax.block_until_ready(top1_forward(x_r, g_r, b_r, force_two_pass=True))
    assert jnp.allclose(out_r, ref_r, atol=2e-5, rtol=2e-5), "masked edge-tile mismatch"

    print("KERNEL_OK")
</pallas_src>

<mosaic_0001>
module attributes {stable_mosaic.version = 11 : i64} {
  func.func @kernel(%arg0: i32, %arg1: memref<2x4x256xf32, #tpu.memory_space<vmem>>, %arg2: memref<1x4x1xf32, #tpu.memory_space<vmem>>, %arg3: memref<1x4x1xf32, #tpu.memory_space<vmem>>, %arg4: memref<2x4x256xf32, #tpu.memory_space<vmem>>) attributes {dimension_semantics = [#tpu.dimension_semantics<arbitrary>], iteration_bounds = array<i64: 1>, scalar_prefetch = 0 : i64, scratch_operands = 0 : i64, tpu.core_type = #tpu.core_type<tc>, window_params = [{pipeline_mode = #tpu.pipeline_mode<synchronous>, transform_indices = @transform_0, window_bounds = array<i64: 2, 4, 256>}, {pipeline_mode = #tpu.pipeline_mode<synchronous>, transform_indices = @transform_1, window_bounds = array<i64: 1, 4, 1>}, {pipeline_mode = #tpu.pipeline_mode<synchronous>, transform_indices = @transform_2, window_bounds = array<i64: 1, 4, 1>}, {pipeline_mode = #tpu.pipeline_mode<synchronous>, transform_indices = @transform_3, window_bounds = array<i64: 2, 4, 256>}]} {
    %c0 = arith.constant 0 : index
    %c0_0 = arith.constant 0 : index
    %c0_1 = arith.constant 0 : index
    %0 = vector.load %arg1[%c0, %c0_0, %c0_1] : memref<2x4x256xf32, #tpu.memory_space<vmem>>, vector<2x4x256xf32>
    %cst = arith.constant dense<0.000000e+00> : vector<2x4xf32>
    %1 = vector.multi_reduction <add>, %0, %cst [2] : vector<2x4x256xf32> to vector<2x4xf32>
    %2 = vector.shape_cast %1 : vector<2x4xf32> to vector<2x4x1xf32>
    %cst_2 = arith.constant dense<0.000000e+00> : vector<4x1xf32>
    %3 = vector.multi_reduction <add>, %2, %cst_2 [0] : vector<2x4x1xf32> to vector<4x1xf32>
    %4 = vector.shape_cast %3 : vector<4x1xf32> to vector<1x4x1xf32>
    %cst_3 = arith.constant dense<0xFF800000> : vector<2x4xf32>
    %5 = vector.multi_reduction <maximumf>, %0, %cst_3 [2] : vector<2x4x256xf32> to vector<2x4xf32>
    %6 = vector.shape_cast %5 : vector<2x4xf32> to vector<2x4x1xf32>
    %cst_4 = arith.constant dense<0xFF800000> : vector<4x1xf32>
    %7 = vector.multi_reduction <maximumf>, %6, %cst_4 [0] : vector<2x4x1xf32> to vector<4x1xf32>
    %8 = vector.shape_cast %7 : vector<4x1xf32> to vector<1x4x1xf32>
    %cst_5 = arith.constant dense<0x7F800000> : vector<2x4xf32>
    %9 = vector.multi_reduction <minimumf>, %0, %cst_5 [2] : vector<2x4x256xf32> to vector<2x4xf32>
    %10 = vector.shape_cast %9 : vector<2x4xf32> to vector<2x4x1xf32>
    %cst_6 = arith.constant dense<0x7F800000> : vector<4x1xf32>
    %11 = vector.multi_reduction <minimumf>, %10, %cst_6 [0] : vector<2x4x1xf32> to vector<4x1xf32>
    %12 = vector.shape_cast %11 : vector<4x1xf32> to vector<1x4x1xf32>
    %cst_7 = arith.constant 0.001953125 : f32
    %13 = vector.broadcast %cst_7 : f32 to vector<1x4x1xf32>
    %14 = arith.mulf %4, %13 : vector<1x4x1xf32>
    %15 = arith.subf %8, %14 : vector<1x4x1xf32>
    %16 = arith.subf %14, %12 : vector<1x4x1xf32>
    %17 = arith.maximumf %15, %16 : vector<1x4x1xf32>
    %cst_8 = arith.constant 0.436962605 : f32
    %18 = vector.broadcast %cst_8 : f32 to vector<1x4x1xf32>
    %19 = arith.mulf %17, %18 : vector<1x4x1xf32>
    %cst_9 = arith.constant 1.000000e-07 : f32
    %20 = vector.broadcast %cst_9 : f32 to vector<1x4x1xf32>
    %21 = arith.addf %19, %20 : vector<1x4x1xf32>
    %cst_10 = arith.constant 1.000000e+00 : f32
    %22 = vector.broadcast %cst_10 : f32 to vector<1x4x1xf32>
    %23 = arith.divf %22, %21 : vector<1x4x1xf32>
    %c0_11 = arith.constant 0 : index
    %c0_12 = arith.constant 0 : index
    %c0_13 = arith.constant 0 : index
    %24 = vector.load %arg2[%c0_11, %c0_12, %c0_13] : memref<1x4x1xf32, #tpu.memory_space<vmem>>, vector<1x4x1xf32>
    %25 = arith.mulf %23, %24 : vector<1x4x1xf32>
    %c0_14 = arith.constant 0 : index
    %c0_15 = arith.constant 0 : index
    %c0_16 = arith.constant 0 : index
    %26 = vector.load %arg3[%c0_14, %c0_15, %c0_16] : memref<1x4x1xf32, #tpu.memory_space<vmem>>, vector<1x4x1xf32>
    %27 = arith.mulf %14, %25 : vector<1x4x1xf32>
    %28 = arith.subf %26, %27 : vector<1x4x1xf32>
    %29 = vector.broadcast %25 : vector<1x4x1xf32> to vector<2x4x256xf32>
    %30 = arith.mulf %0, %29 : vector<2x4x256xf32>
    %31 = vector.broadcast %28 : vector<1x4x1xf32> to vector<2x4x256xf32>
    %32 = arith.addf %30, %31 : vector<2x4x256xf32>
    %c0_17 = arith.constant 0 : index
    %c0_18 = arith.constant 0 : index
    %c0_19 = arith.constant 0 : index
    %33 = vector.load %arg4[%c0_17, %c0_18, %c0_19] : memref<2x4x256xf32, #tpu.memory_space<vmem>>, vector<2x4x256xf32>
    tpu.vector_store %arg4[%c0_17, %c0_18, %c0_19], %32 {strides = array<i32>} : memref<2x4x256xf32, #tpu.memory_space<vmem>>, vector<2x4x256xf32>,
    return
  }
  func.func @transform_0(%arg0: i32) -> (i32, i32, i32) {
    %c0_i32 = arith.constant 0 : i32
    %c0_i32_0 = arith.constant 0 : i32
    %c0_i32_1 = arith.constant 0 : i32
    %c0_i32_2 = arith.constant 0 : i32
    return %c0_i32, %c0_i32_0, %c0_i32_1 : i32, i32, i32
  }
  func.func @transform_1(%arg0: i32) -> (i32, i32, i32) {
    %c0_i32 = arith.constant 0 : i32
    %c0_i32_0 = arith.constant 0 : i32
    %c0_i32_1 = arith.constant 0 : i32
    %c0_i32_2 = arith.constant 0 : i32
    return %c0_i32, %c0_i32_0, %c0_i32_1 : i32, i32, i32
  }
  func.func @transform_2(%arg0: i32) -> (i32, i32, i32) {
    %c0_i32 = arith.constant 0 : i32
    %c0_i32_0 = arith.constant 0 : i32
    %c0_i32_1 = arith.constant 0 : i32
    %c0_i32_2 = arith.constant 0 : i32
    return %c0_i32, %c0_i32_0, %c0_i32_1 : i32, i32, i32
  }
  func.func @transform_3(%arg0: i32) -> (i32, i32, i32) {
    %c0_i32 = arith.constant 0 : i32
    %c0_i32_0 = arith.constant 0 : i32
    %c0_i32_1 = arith.constant 0 : i32
    %c0_i32_2 = arith.constant 0 : i32
    return %c0_i32, %c0_i32_0, %c0_i32_1 : i32, i32, i32
  }
}

</mosaic_0001>

<bundles_post_ra>
// kernel: tpu_custom_call.1
= control target key start
LH: loop header
LB: loop body
LE: loop exit
PB: predicated region body
PF: predicated region fallthrough
CT: control target
= control target key end

     0   :  { %8 = vsyncpa [#allocation3], 0  ;;  %s271_s0 = inlined_call_operand.hbm [shape: f32[2,4,256], index: 0, kind: input, shape index: {}]   ;;  %s272_s1 = inlined_call_operand.vmem [shape: f32[1,4,1], index: 1, kind: input, shape index: {}]   ;;  %s273_s2 = inlined_call_operand.vmem [shape: f32[1,4,1], index: 2, kind: input, shape index: {}]   ;;  %s274_s3 = inlined_call_operand.hbm [shape: f32[2,4,256], index: 3, kind: output, shape index: {}]  }
   0x1   :  { %9 = vsyncpa [#allocation4], 0  ;;  %s193_s12 = smov [#allocation2]  }
   0x2   :  { %s15_s13 = sshll.u32 %s193_s12, 4  ;;  %s16_s13 = int_to_ptr.vmem [resolvable:$true] %s15_s13 }
   0x3   :  { %s157_s14 = scalar_lea.vmem %s16_s13, 256  ;;  %p162_p1 = scmp.lt.s32.totalorder %s16_s13, %s16_s13 }
   0x4   :  { %p158_p0 = scmp.ne.s32.totalorder %s16_s13, %s157_s14  ;;  %p163_p2 = scmp.lt.s32.totalorder %s157_s14, %s157_s14 }
   0x6   :  { %p164_p3 = por %p163_p2, %p162_p1 }
   0x8   :  { %p165_p4 = pnand %p164_p3, %p158_p0 }
   0xa   :  { %168 = shalt.err (!%p165_p4)
}
   0xb   :  { %s194_s15 = smov 128   ;;  %s195_s16 = smov 8  }
   0xc   :  { %21 = dma.hbm_to_vmem [thread:$0]  %s271_s0, 256, %s16_s13, [#allocation3], %s194_s15, %s194_s15, %s195_s16  }
   0xd   :  { %189 = dma.done.wait [#allocation3], 256  }
   0xe   :  { %190 = vsyncadd [#allocation3], 4294967040  ;;  %vm37_vm0 = vcmask 1043456   ;;  %v225_v0 = vld [vmem:[#allocation2] sm:$0xff]  ;;  %v227_v1 = vld [vmem:[#allocation2 + $0x8] sm:$0xff]  ;;  %v196_v22 = vmov 0   ;;  %v97_v52 = vlaneseq }
   0xf   :  { %v33_v2 = vcombine.high %v225_v0, %v225_v0  ;;  %v51_v3 = vsel %vm37_vm0, %v225_v0, -inf  ;;  %v38_v4 = vsel %vm37_vm0, %v225_v0, 0.0  ;;  %v34_v5 = vcombine.high %v227_v1, %v227_v1  ;;  %143 = vset.pattern.permute.xlu0 %v196_v22  ;;  %144 = vset.pattern.permute.xlu1 %v196_v22  ;;  %v85_v44 = vld [vmem:[%s272_s1] sm:$0xf]  ;;  %s198_s1 = smov [#allocation5]  }
  0x10   :  { %v56_v6 = vsel %vm37_vm0, %v227_v1, -inf  ;;  %v43_v7 = vsel %vm37_vm0, %v227_v1, 0.0  ;;  %v69_v16 = vsel %vm37_vm0, %v227_v1, inf  ;;  %v64_v18 = vsel %vm37_vm0, %v225_v0, inf  ;;  %v87_v47 = vld [vmem:[%s273_s2] sm:$0xf] }
  0x11   :  { %v52_v8 = vsel %vm37_vm0, %v33_v2, -inf  ;;  %v39_v9 = vsel %vm37_vm0, %v33_v2, 0.0  ;;  %v57_v10 = vsel %vm37_vm0, %v34_v5, -inf  ;;  %v44_v11 = vsel %vm37_vm0, %v34_v5, 0.0  ;;  %s125_s22 = sshll.u32 %s198_s1, 4  ;;  %s126_s22 = int_to_ptr.vmem [resolvable:$true] %s125_s22 }
  0x12   :  { %v53_v12 = vmax.f32 %v51_v3, %v52_v8  ;;  %v40_v13 = vadd.f32 %v39_v9, %v38_v4  ;;  %v58_v14 = vmax.f32 %v56_v6, %v57_v10  ;;  %v45_v15 = vadd.f32 %v44_v11, %v43_v7  ;;  %s169_s2 = scalar_lea.vmem %s126_s22, 256  ;;  %p174_p6 = scmp.lt.s32.totalorder %s126_s22, %s126_s22 }
  0x13   :  { %v70_v17 = vsel %vm37_vm0, %v34_v5, inf  ;;  %v65_v19 = vsel %vm37_vm0, %v33_v2, inf  ;;  %v197_v50 = vmov 839922192   ;;  %v98_v54 = vshrl.u32 %v97_v52, 7  ;;  %p170_p5 = scmp.ne.s32.totalorder %s126_s22, %s169_s2  ;;  %p175_p7 = scmp.lt.s32.totalorder %s169_s2, %s169_s2 }
  0x14   :  { %54 = vmax.xlane.f32.xlu1 %v53_v12  ;;  %41 = vadd.xlane.f32.xlu0 %v40_v13  ;;  %v71_v20 = vmin.f32 %v69_v16, %v70_v17  ;;  %v66_v21 = vmin.f32 %v64_v18, %v65_v19  ;;  %v95_v51 = vunpack.c.l.s4 %v197_v50 }
  0x15   :  { %p176_p8 = por %p175_p7, %p174_p6 }
  0x16   :  { %v96_v53 = vunpack.c.0.s8 %v95_v51 }
  0x17   :  { %p177_p9 = pnand %p176_p8, %p170_p5 }
  0x18   :  { %59 = vmax.xlane.f32.xlu1 %v58_v14  ;;  %46 = vadd.xlane.f32.xlu0 %v45_v15  ;;  %v99_v55 = vsub.s32 %v96_v53, %v98_v54 }
  0x1c   :  { %72 = vmin.xlane.f32.xlu1 %v71_v20  ;;  %67 = vmin.xlane.f32.xlu0 %v66_v21 }
  0x9d   :  { %v55_v23 = vpop.xlane.xlu1 %54  ;;  %v42_v24 = vpop.xlane.xlu0 %41 }
  0x9e   :  { %v48_v27 = vsel %vm37_vm0, %v42_v24, 0.0  ;;  %v61_v34 = vsel %vm37_vm0, %v55_v23, -inf }
  0xa1   :  { %v60_v25 = vpop.xlane.xlu1 %59  ;;  %v47_v26 = vpop.xlane.xlu0 %46 }
  0xa2   :  { %v49_v28 = vsel %vm37_vm0, %v47_v26, 0.0  ;;  %v62_v30 = vsel %vm37_vm0, %v60_v25, -inf }
  0xa3   :  { %v50_v29 = vadd.f32 %v49_v28, %v48_v27  ;;  %v63_v37 = vmax.f32 %v61_v34, %v62_v30 }
  0xa5   :  { %v77_v31 = vmul.f32 0.001953125, %v50_v29  ;;  %v73_v32 = vpop.xlane.xlu1 %72  ;;  %v68_v33 = vpop.xlane.xlu0 %67 }
  0xa6   :  { %v75_v35 = vsel %vm37_vm0, %v73_v32, inf  ;;  %v74_v36 = vsel %vm37_vm0, %v68_v33, inf }
  0xa7   :  { %v76_v38 = vmin.f32 %v74_v36, %v75_v35  ;;  %v78_v39 = vsub.f32 %v63_v37, %v77_v31 }
  0xa9   :  { %v79_v40 = vsub.f32 %v77_v31, %v76_v38 }
  0xab   :  { %v80_v41 = vmax.f32 %v78_v39, %v79_v40 }
  0xad   :  { %v81_v42 = vmul.f32 0.4369626, %v80_v41 }
  0xaf   :  { %v82_v43 = vadd.f32 1e-07, %v81_v42 }
  0xb1   :  { %147 = vrcp.f32 %v82_v43 }
  0xbe   :  { %v148_v45 = vpop.eup %147 }
  0xbf   :  { %v86_v46 = vmul.f32 %v148_v45, %v85_v44 }
  0xc1   :  { %92 = vperm.xlu0 %143, %v86_v46   ;;  %v88_v48 = vmul.f32 %v86_v46, %v77_v31 }
  0xc3   :  { %v89_v49 = vsub.f32 %v87_v47, %v88_v48 }
  0xc5   :  { %106 = vperm.xlu1 %144, %v89_v49  }
 0x13c   :  { %v93_v56 = vpop.permute.xlu0 %92 }
 0x13d   :  { %v100_v57 = vrot.slane %v93_v56, %v99_v55 }
 0x13f   :  { %v102_v59 = vmul.f32 %v100_v57, %v225_v0  ;;  %v103_v60 = vmul.f32 %v100_v57, %v227_v1 }
 0x140   :  { %v107_v58 = vpop.permute.xlu1 %106 }
 0x141   :  { %v114_v61 = vrot.slane %v107_v58, %v99_v55 }
 0x143   :  { %v116_v62 = vadd.f32 %v114_v61, %v102_v59  ;;  %v117_v63 = vadd.f32 %v114_v61, %v103_v60 }
 0x145   :  { %118 = vst [vmem:[#allocation5] sm:$0xff] %v116_v62  ;;  %119 = vst [vmem:[#allocation5 + $0x8] sm:$0xff] %v117_v63 }
 0x146   :  { %180 = shalt.err (!%p177_p9)
}
 0x147   :  { %131 = dma.vmem_to_hbm [thread:$0]  %s126_s22, 256, %s274_s3, [#allocation4], %s194_s15, %s194_s15, %s195_s16  }
 0x148   :  { %191 = dma.done.wait [#allocation4], 256  }
 0x149   :  { %192 = vsyncadd [#allocation4], 4294967040 }
 0x14a   :  { %135 = vsyncpa [#allocation3], 1 }
 0x14b   :  { %136 = vsyncpa [#allocation4], 1 }

</bundles_post_ra>
